<compile_context>
chip_gen: v6e
topology: v6e:2x2x1
jax: 0.10.0
libtpu: 0.0.40
codegen_flags: <defaults>
</compile_context>

<pallas_src>
import jax
import jax.numpy as jnp
import numpy as np
from jax.experimental import pallas as pl
from jax.experimental.pallas import tpu as pltpu


# ------------------------- host-side constant builders ----------------------

def interp_matrix_align_corners_np(n_out, n_in):
    """Row-stochastic (n_out, n_in) matrix for 1-D linear interp, align_corners=True."""
    if n_in == 1:
        return np.ones((n_out, 1), np.float32)
    if n_out == 1:
        a = np.zeros((1, n_in), np.float32)
        a[0, 0] = 1.0
        return a
    src = np.arange(n_out, dtype=np.float64) * (float(n_in - 1) / float(n_out - 1))
    lo = np.clip(np.floor(src).astype(np.int64), 0, n_in - 2)
    frac = (src - lo).astype(np.float32)
    rows = np.arange(n_out)
    a = np.zeros((n_out, n_in), np.float32)
    a[rows, lo] += 1.0 - frac
    a[rows, lo + 1] += frac
    return a


# ------------------------------- Pallas kernel ------------------------------

def _seghead_fused_kernel(m_ref, awt_ref, b_ref, x_ref, o_ref):
    # m_ref  : (2*Hout, Cin*Hin)  -- channel mix folded into height interp
    # awt_ref: (Win, Wout)        -- composed width interp (transposed)
    # b_ref  : (2*Hout, 1)        -- effective bias per output row
    # x_ref  : (1, Cin*Hin, Win)  -- one batch element (NCHW flattened over C,H)
    # o_ref  : (1, 2*Hout, Wout)
    tmp = jnp.dot(m_ref[...], x_ref[0], preferred_element_type=jnp.float32)
    o_ref[0] = (
        jnp.dot(tmp, awt_ref[...], preferred_element_type=jnp.float32) + b_ref[...]
    )


def seghead_fused(x_nchw, m_big, a_wT, bias_col, Hout, Wout):
    """Entire SegHead forward as one pallas_call.  x_nchw: (N, Cin, Hin, Win) f32."""
    N, Cin, Hin, Win = x_nchw.shape
    x_flat = x_nchw.reshape(N, Cin * Hin, Win).astype(jnp.float32)  # metadata-only reshape
    out = pl.pallas_call(
        _seghead_fused_kernel,
        out_shape=jax.ShapeDtypeStruct((N, 2 * Hout, Wout), jnp.float32),
        grid_spec=pltpu.PrefetchScalarGridSpec(
            num_scalar_prefetch=0,
            grid=(N,),  # >=2 parallel steps keeps both v7x TensorCores busy
            in_specs=[
                pl.BlockSpec((2 * Hout, Cin * Hin), lambda n: (0, 0)),
                pl.BlockSpec((Win, Wout), lambda n: (0, 0)),
                pl.BlockSpec((2 * Hout, 1), lambda n: (0, 0)),
                pl.BlockSpec((1, Cin * Hin, Win), lambda n: (n, 0, 0)),
            ],
            out_specs=pl.BlockSpec((1, 2 * Hout, Wout), lambda n: (n, 0, 0)),
        ),
        compiler_params=pltpu.CompilerParams(
            dimension_semantics=("parallel",)),
        # NOTE: per-grid-step VMEM = full per-batch slabs; at the test shapes this is
        # ~40 KiB. For production img_size=(512,832) it is a few MiB per buffer, still
        # well under the 32 MiB scoped default on v6e/v7x; raise vmem_limit_bytes or
        # tile the 2*Hout rows if Cin*Hin grows very large.
    )(m_big, a_wT, bias_col, x_flat)
    return out.reshape(N, 2, Hout, Wout)


# ------------------------------- module wrapper ------------------------------

class SegHeadPallas:
    """Pallas implementation of SegHead.forward (NCHW in, NCHW out)."""

    def __init__(self, in_chans, img_size=(512, 832), key=None):
        self.img_size = tuple(img_size)
        self.in_chans = in_chans
        key = jax.random.PRNGKey(0) if key is None else key
        k0, k1, k2, k3 = jax.random.split(key, 4)
        # conv:  nn.Conv2d(in_chans, 2, 1)  -> weight (Cin, 2), bias (2,)
        self.w0 = jax.random.normal(k0, (in_chans, 2), jnp.float32) * 0.1
        self.b0 = jax.random.normal(k1, (2,), jnp.float32) * 0.1
        # conv1: nn.Conv2d(2, 2, 1) (re-used 3 times, same weights)
        self.w1 = jax.random.normal(k2, (2, 2), jnp.float32) * 0.1
        self.b1 = jax.random.normal(k3, (2,), jnp.float32) * 0.1

        # Fold the 4 pointwise convs into one (Cin, 2) weight and (2,) bias.
        w0, b0, w1, b1 = (np.asarray(a) for a in (self.w0, self.b0, self.w1, self.b1))
        w_eff, b_eff = w0, b0
        for _ in range(3):
            w_eff = w_eff @ w1
            b_eff = b_eff @ w1 + b1
        self._w_eff = w_eff.astype(np.float32)   # (Cin, 2)
        self._b_eff = b_eff.astype(np.float32)   # (2,)
        self._cache = {}                         # (Hin, Win) -> device constants

    def _constants(self, Hin, Win):
        key = (Hin, Win)
        if key not in self._cache:
            Hout, Wout = self.img_size
            # Compose the 4 align_corners=True resizes into one H and one W matrix.
            a_h = interp_matrix_align_corners_np(2 * Hin, Hin)
            a_h = interp_matrix_align_corners_np(4 * Hin, 2 * Hin) @ a_h
            a_h = interp_matrix_align_corners_np(8 * Hin, 4 * Hin) @ a_h
            a_h = interp_matrix_align_corners_np(Hout, 8 * Hin) @ a_h      # (Hout, Hin)
            a_w = interp_matrix_align_corners_np(4 * Win, Win)
            a_w = interp_matrix_align_corners_np(8 * Win, 4 * Win) @ a_w
            a_w = interp_matrix_align_corners_np(16 * Win, 8 * Win) @ a_w
            a_w = interp_matrix_align_corners_np(Wout, 16 * Win) @ a_w     # (Wout, Win)
            # Fold channel mix into the height matrix:
            #   M[c*Hout + ho, ci*Hin + hi] = W_eff[ci, c] * a_h[ho, hi]
            m_big = (self._w_eff.T[:, None, :, None] * a_h[None, :, None, :]
                     ).reshape(2 * Hout, self.in_chans * Hin).astype(np.float32)
            bias_col = np.repeat(self._b_eff, Hout).reshape(2 * Hout, 1).astype(np.float32)
            self._cache[key] = (
                jnp.asarray(m_big),
                jnp.asarray(np.ascontiguousarray(a_w.T)),   # (Win, Wout)
                jnp.asarray(bias_col),
            )
        return self._cache[key]

    def __call__(self, x):
        N, C, Hin, Win = x.shape
        assert C == self.in_chans, (C, self.in_chans)
        Hout, Wout = self.img_size
        m_big, a_wT, bias_col = self._constants(Hin, Win)
        return seghead_fused(x, m_big, a_wT, bias_col, Hout, Wout)


# ----------------------- pure-JAX staged reference (check) -------------------

def _ref_forward(model, x):
    """Stage-by-stage forward matching the PyTorch module (conv/resize interleaved)."""
    def conv(x, w, b):
        return jnp.einsum('nchw,cd->ndhw', x, w) + b[None, :, None, None]

    def up(x, Ho, Wo):
        A_h = jnp.asarray(interp_matrix_align_corners_np(Ho, x.shape[2]))
        A_w = jnp.asarray(interp_matrix_align_corners_np(Wo, x.shape[3]))
        return jnp.einsum('hH,ncHW,wW->nchw', A_h, x, A_w)

    x = conv(x, model.w0, model.b0)
    _, _, h, w = x.shape
    for (Ho, Wo) in [(h * 2, w * 4), (h * 4, w * 8), (h * 8, w * 16)]:
        x = up(x, Ho, Wo)
        x = conv(x, model.w1, model.b1)
    return up(x, model.img_size[0], model.img_size[1])


# ----------------------------------- main ------------------------------------

if __name__ == "__main__":
    key = jax.random.PRNGKey(0)
    k_in, k_par = jax.random.split(key)

    N, C, H, W = 2, 4, 8, 8          # small NCHW input
    img_size = (40, 72)              # final F.interpolate target (H, W)

    x = jax.random.normal(k_in, (N, C, H, W), jnp.float32)
    model = SegHeadPallas(in_chans=C, img_size=img_size, key=k_par)

    out = jax.block_until_ready(model(x))
    assert out.shape == (N, 2, img_size[0], img_size[1]), out.shape

    ref = jax.block_until_ready(_ref_forward(model, x))
    if not np.allclose(np.asarray(out), np.asarray(ref), rtol=1e-2, atol=1e-2):
        raise AssertionError("Pallas SegHead output mismatch vs JAX reference")

    print("KERNEL_OK")
</pallas_src>

<mosaic_0001>
module attributes {stable_mosaic.version = 11 : i64} {
  func.func @_seghead_fused_kernel(%arg0: i32, %arg1: memref<80x32xf32, #tpu.memory_space<vmem>>, %arg2: memref<8x72xf32, #tpu.memory_space<vmem>>, %arg3: memref<80x1xf32, #tpu.memory_space<vmem>>, %arg4: memref<1x32x8xf32, #tpu.memory_space<vmem>>, %arg5: memref<1x80x72xf32, #tpu.memory_space<vmem>>) attributes {dimension_semantics = [#tpu.dimension_semantics<parallel>], iteration_bounds = array<i64: 2>, scalar_prefetch = 0 : i64, scratch_operands = 0 : i64, tpu.core_type = #tpu.core_type<tc>, window_params = [{pipeline_mode = #tpu.pipeline_mode<synchronous>, transform_indices = @transform_0, window_bounds = array<i64: 80, 32>}, {pipeline_mode = #tpu.pipeline_mode<synchronous>, transform_indices = @transform_1, window_bounds = array<i64: 8, 72>}, {pipeline_mode = #tpu.pipeline_mode<synchronous>, transform_indices = @transform_2, window_bounds = array<i64: 80, 1>}, {transform_indices = @transform_3, window_bounds = array<i64: 1, 32, 8>}, {transform_indices = @transform_4, window_bounds = array<i64: 1, 80, 72>}]} {
    %c0 = arith.constant 0 : index
    %c0_0 = arith.constant 0 : index
    %0 = vector.load %arg1[%c0, %c0_0] : memref<80x32xf32, #tpu.memory_space<vmem>>, vector<80x32xf32>
    %c0_1 = arith.constant 0 : index
    %c0_2 = arith.constant 0 : index
    %c0_3 = arith.constant 0 : index
    %1 = vector.load %arg4[%c0_1, %c0_2, %c0_3] : memref<1x32x8xf32, #tpu.memory_space<vmem>>, vector<1x32x8xf32>
    %2 = vector.shape_cast %1 : vector<1x32x8xf32> to vector<32x8xf32>
    %cst = arith.constant dense<0.000000e+00> : vector<80x8xf32>
    %3 = tpu.matmul %0, %2, %cst {dimension_numbers = #tpu.dot_dimension_numbers<[1], [0], [0], [1], [0, 0, 1, 1], [], []>} : vector<80x32xf32>, vector<32x8xf32>, vector<80x8xf32> -> vector<80x8xf32>
    %c0_4 = arith.constant 0 : index
    %c0_5 = arith.constant 0 : index
    %4 = vector.load %arg2[%c0_4, %c0_5] : memref<8x72xf32, #tpu.memory_space<vmem>>, vector<8x72xf32>
    %cst_6 = arith.constant dense<0.000000e+00> : vector<80x72xf32>
    %5 = tpu.matmul %3, %4, %cst_6 {dimension_numbers = #tpu.dot_dimension_numbers<[1], [0], [0], [1], [0, 0, 1, 1], [], []>} : vector<80x8xf32>, vector<8x72xf32>, vector<80x72xf32> -> vector<80x72xf32>
    %c0_7 = arith.constant 0 : index
    %c0_8 = arith.constant 0 : index
    %6 = vector.load %arg3[%c0_7, %c0_8] : memref<80x1xf32, #tpu.memory_space<vmem>>, vector<80x1xf32>
    %7 = vector.broadcast %6 : vector<80x1xf32> to vector<80x72xf32>
    %8 = arith.addf %5, %7 : vector<80x72xf32>
    %c0_9 = arith.constant 0 : index
    %c0_10 = arith.constant 0 : index
    %c0_11 = arith.constant 0 : index
    %9 = vector.load %arg5[%c0_9, %c0_10, %c0_11] : memref<1x80x72xf32, #tpu.memory_space<vmem>>, vector<1x80x72xf32>
    %10 = vector.shape_cast %9 : vector<1x80x72xf32> to vector<80x72xf32>
    %11 = vector.shape_cast %8 : vector<80x72xf32> to vector<1x80x72xf32>
    tpu.vector_store %arg5[%c0_9, %c0_10, %c0_11], %11 {strides = array<i32>} : memref<1x80x72xf32, #tpu.memory_space<vmem>>, vector<1x80x72xf32>,
    return
  }
  func.func @transform_0(%arg0: i32) -> (i32, i32) {
    %c0_i32 = arith.constant 0 : i32
    %c0_i32_0 = arith.constant 0 : i32
    %c0_i32_1 = arith.constant 0 : i32
    return %c0_i32, %c0_i32_0 : i32, i32
  }
  func.func @transform_1(%arg0: i32) -> (i32, i32) {
    %c0_i32 = arith.constant 0 : i32
    %c0_i32_0 = arith.constant 0 : i32
    %c0_i32_1 = arith.constant 0 : i32
    return %c0_i32, %c0_i32_0 : i32, i32
  }
  func.func @transform_2(%arg0: i32) -> (i32, i32) {
    %c0_i32 = arith.constant 0 : i32
    %c0_i32_0 = arith.constant 0 : i32
    %c0_i32_1 = arith.constant 0 : i32
    return %c0_i32, %c0_i32_0 : i32, i32
  }
  func.func @transform_3(%arg0: i32) -> (i32, i32, i32) {
    %c0_i32 = arith.constant 0 : i32
    %c0_i32_0 = arith.constant 0 : i32
    %c0_i32_1 = arith.constant 0 : i32
    return %arg0, %c0_i32, %c0_i32_0 : i32, i32, i32
  }
  func.func @transform_4(%arg0: i32) -> (i32, i32, i32) {
    %c0_i32 = arith.constant 0 : i32
    %c0_i32_0 = arith.constant 0 : i32
    %c0_i32_1 = arith.constant 0 : i32
    return %arg0, %c0_i32, %c0_i32_0 : i32, i32, i32
  }
}

</mosaic_0001>

<bundles_post_ra>
// kernel: tpu_custom_call.1
= control target key start
LH: loop header
LB: loop body
LE: loop exit
PB: predicated region body
PF: predicated region fallthrough
CT: control target
= control target key end

     0   :  { %s773_s15 = smov 0   ;;  %s899_s0 = inlined_call_operand.vmem [shape: f32[80,32], index: 0, kind: input, shape index: {}]   ;;  %s900_s1 = inlined_call_operand.vmem [shape: f32[8,72], index: 1, kind: input, shape index: {}]   ;;  %s901_s2 = inlined_call_operand.vmem [shape: f32[80,1], index: 2, kind: input, shape index: {}]   ;;  %s902_s3 = inlined_call_operand.vmem [shape: f32[2,32,8], index: 3, kind: input, shape index: {}]   ;;  %s903_s4 = inlined_call_operand.vmem [shape: f32[2,80,72], index: 4, kind: output, shape index: {}]  }
   0x1 LB: > { %s631_s16 = sadd.s32 4294967295, %s745_s15   ;;  %p635_p0 = scmp.ge.s32.totalorder %s745_s15, 1  ;;  %s745_s15 = sphi %s773_s15, %s14_s15  }
   0x2   : > { %p162_p1 = scmp.lt.s32.totalorder %s745_s15, 3 }
   0x4   : > { %p163_p2 = pnand %p635_p0, %p162_p1 }
   0x5   : > { %p188_p3 = scmp.lt.s32.totalorder (!%p163_p2), %s631_s16, 1 }
   0x6   : > { %166 = sbr.rel (%p163_p2) target bundleno = 433 (0x1b1), region = 36 }
   0xb   : > { %v198_v0 = vld [vmem:[%s899_s0] sm:$0xff]  ;;  %vm212_vm0 = vcmask 261120   ;;  %s905_s16 = smov (!%p188_p3, %s631_s16), 1  ;;  %v199_v5 = vld [vmem:[%s899_s0 + $0x8] sm:$0xff]  ;;  %v200_v6 = vld [vmem:[%s899_s0 + $0x10] sm:$0xff]  ;;  %v747_v17 = vmov 0  }
   0xc   : > { %695 = vmatprep.mubr.msk.f32.mxu0 %vm212_vm0, %v198_v0  ;;  %s661_s19 = sshll.u32 %s905_s16, 5  ;;  %v201_v7 = vld [vmem:[%s899_s0 + $0x18] sm:$0xff]  ;;  %v202_v8 = vld [vmem:[%s899_s0 + $0x20] sm:$0xff]  ;;  %v203_v9 = vld [vmem:[%s899_s0 + $0x28] sm:$0xff]  ;;  %738 = vset.pattern.permute.xlu1 %v747_v17  ;;  %vm419_vm1 = vcmask 64512   ;;  %s727_s13 = smul.u32 80, %s905_s16 }
   0xd   : > { %s192_s22 = scalar_lea.vmem %s902_s3, %s661_s19  ;;  %v204_v10 = vld [vmem:[%s899_s0 + $0x30] sm:$0xff]  ;;  %v205_v11 = vld [vmem:[%s899_s0 + $0x38] sm:$0xff]  ;;  %v206_v12 = vld [vmem:[%s899_s0 + $0x40] sm:$0xff]  ;;  %737 = vset.pattern.permute.xlu0 %v747_v17  ;;  %vm565_vm2 = vcmask 588800  }
   0xe   : > { %v211_v1 = vld [vmem:[%s192_s22 + $0x18] sm:$0xff]  ;;  %v210_v2 = vld [vmem:[%s192_s22 + $0x10] sm:$0xff]  ;;  %v209_v3 = vld [vmem:[%s192_s22 + $0x8] sm:$0xff]  ;;  %s874_s18 = scalar_lea.vmem %s903_s4, %s727_s13 }
   0xf   : > { %687 = vmatprep.subr.mxu0 %v211_v1  ;;  %v208_v4 = vld [vmem:[%s192_s22] sm:$0xff]  ;;  %v207_v13 = vld [vmem:[%s899_s0 + $0x48] sm:$0xff]  ;;  %v361_v15 = vld [vmem:[%s901_s2 + $0x10] sm:$0xff] }
  0x10   : > { %688 = vmatpush3.msra.mxu0 %v211_v1  ;;  %v358_v14 = vld [vmem:[%s900_s1] sm:$0xff]  ;;  %381 = vperm.xlu1 %738, %v361_v15   ;;  %v362_v18 = vld [vmem:[%s901_s2 + $0x18] sm:$0xff]  ;;  %v360_v19 = vld [vmem:[%s901_s2 + $0x8] sm:$0xff] }
  0x11   : > { %689 = vmatprep.subr.mxu0 %v210_v2  ;;  %710 = vmatprep.subr.mxu1 %v358_v14  ;;  %v359_v16 = vld [vmem:[%s901_s2] sm:$0xff]  ;;  %v364_v20 = vld [vmem:[%s901_s2 + $0x28] sm:$0xff]  ;;  %v366_v22 = vld [vmem:[%s901_s2 + $0x38] sm:$0xff] }
  0x12   : > { %690 = vmatpush3.msra.mxu0 %v210_v2  ;;  %711 = vmatpush3.msra.mxu1 %v358_v14  ;;  %v363_v21 = vld [vmem:[%s901_s2 + $0x20] sm:$0xff]  ;;  %v365_v23 = vld [vmem:[%s901_s2 + $0x30] sm:$0xff]  ;;  %v368_v24 = vld [vmem:[%s901_s2 + $0x48] sm:$0xff] }
  0x13   : > { %691 = vmatprep.subr.mxu0 %v209_v3  ;;  %371 = vperm.xlu0 %737, %v359_v16   ;;  %v367_v25 = vld [vmem:[%s901_s2 + $0x40] sm:$0xff] }
  0x14   : > { %692 = vmatpush3.msra.mxu0 %v209_v3  ;;  %386 = vperm.xlu1 %738, %v362_v18  }
  0x15   : > { %693 = vmatprep.subr.mxu0 %v208_v4 }
  0x16   : > { %694 = vmatpush3.msra.mxu0 %v208_v4 }
  0x17   : > { %696 = vmatmul.mubr.msk.f32.vlgmr.msra.gmra.mxu0 %vm212_vm0, %v199_v5  ;;  %376 = vperm.xlu0 %737, %v360_v19  }
  0x18   : > { %698 = vmatprep.mubr.msk.f32.mxu0 %vm212_vm0, %v200_v6  ;;  %396 = vperm.xlu1 %738, %v364_v20  }
  0x1b   : > { %699 = vmatmul.mubr.msk.f32.gmra.mxu0 %vm212_vm0, %v201_v7  ;;  %391 = vperm.xlu0 %737, %v363_v21  }
  0x1c   : > { %701 = vmatprep.mubr.msk.f32.mxu0 %vm212_vm0, %v202_v8  ;;  %406 = vperm.xlu1 %738, %v366_v22  }
  0x1f   : > { %702 = vmatmul.mubr.msk.f32.gmra.mxu0 %vm212_vm0, %v203_v9  ;;  %401 = vperm.xlu0 %737, %v365_v23  }
  0x20   : > { %704 = vmatprep.mubr.msk.f32.mxu0 %vm212_vm0, %v204_v10  ;;  %416 = vperm.xlu1 %738, %v368_v24  }
  0x23   : > { %705 = vmatmul.mubr.msk.f32.gmra.mxu0 %vm212_vm0, %v205_v11  ;;  %411 = vperm.xlu0 %737, %v367_v25  }
  0x24   : > { %707 = vmatprep.mubr.msk.f32.mxu0 %vm212_vm0, %v206_v12 }
  0x27   : > { %708 = vmatmul.mubr.msk.f32.gmra.mxu0 %vm212_vm0, %v207_v13 }
  0x8b   : > { %v382_v36 = vpop.permute.xlu1 %381 }
  0x8e   : > { %v372_v37 = vpop.permute.xlu0 %371 }
  0x8f   : > { %v387_v38 = vpop.permute.xlu1 %386 }
  0x92   : > { %v377_v39 = vpop.permute.xlu0 %376 }
  0x93   : > { %v397_v44 = vpop.permute.xlu1 %396 }
  0x96   : > { %v392_v47 = vpop.permute.xlu0 %391 }
  0x97   : > { %v407_v52 = vpop.permute.xlu1 %406 }
  0x9a   : > { %v402_v55 = vpop.permute.xlu0 %401 }
  0x9b   : > { %v417_v60 = vpop.permute.xlu1 %416 }
  0x9e   : > { %v412_v63 = vpop.permute.xlu0 %411 }
  0xd7   : > { %v697_v26 = vpop.f32.mrf.mxu0 }
  0xd9   : > { %v309_v27 = vpop.f32.mrf.mxu0 }
  0xda   : > { %712 = vmatprep.mubr.msk.f32.mxu1 %vm419_vm1, %v309_v27 }
  0xdb   : > { %v700_v28 = vpop.f32.mrf.mxu0  ;;  %713 = vmatmul.mubr.msk.f32.vlgmr.msra.gmra.mxu1 %vm419_vm1, %v697_v26 }
  0xdd   : > { %v319_v29 = vpop.f32.mrf.mxu0 }
  0xde   : > { %715 = vmatprep.mubr.msk.f32.mxu1 %vm419_vm1, %v319_v29 }
  0xdf   : > { %v703_v30 = vpop.f32.mrf.mxu0  ;;  %716 = vmatmul.mubr.msk.f32.gmra.mxu1 %vm419_vm1, %v700_v28 }
  0xe1   : > { %v329_v31 = vpop.f32.mrf.mxu0 }
  0xe2   : > { %718 = vmatprep.mubr.msk.f32.mxu1 %vm419_vm1, %v329_v31 }
  0xe3   : > { %v706_v32 = vpop.f32.mrf.mxu0  ;;  %719 = vmatmul.mubr.msk.f32.gmra.mxu1 %vm419_vm1, %v703_v30 }
  0xe5   : > { %v339_v33 = vpop.f32.mrf.mxu0 }
  0xe6   : > { %721 = vmatprep.mubr.msk.f32.mxu1 %vm419_vm1, %v339_v33 }
  0xe7   : > { %v709_v34 = vpop.f32.mrf.mxu0  ;;  %722 = vmatmul.mubr.msk.f32.gmra.mxu1 %vm419_vm1, %v706_v32 }
  0xe9   : > { %v349_v35 = vpop.f32.mrf.mxu0 }
  0xea   : > { %724 = vmatprep.mubr.msk.f32.mxu1 %vm419_vm1, %v349_v35 }
  0xeb   : > { %725 = vmatmul.mubr.msk.f32.gmra.mxu1 %vm419_vm1, %v709_v34 }
 0x19b   : > { %v714_v40 = vpop.f32.mrf.mxu1 }
 0x19c   : > { %v522_v41 = vadd.f32 %v714_v40, %v377_v39 }
 0x19d   : > { %v516_v42 = vpop.f32.mrf.mxu1 }
 0x19e   : > { %567 = vst.msk [vmem:[%s874_s18 + $0x8] sm:$0xff] %vm565_vm2, %v522_v41  ;;  %v517_v43 = vadd.f32 %v516_v42, %v372_v37 }
 0x19f   : > { %v717_v45 = vpop.f32.mrf.mxu1 }
 0x1a0   : > { %566 = vst.msk [vmem:[%s874_s18] sm:$0xff] %vm565_vm2, %v517_v43  ;;  %v532_v46 = vadd.f32 %v717_v45, %v387_v38 }
 0x1a1   : > { %v526_v48 = vpop.f32.mrf.mxu1 }
 0x1a2   : > { %569 = vst.msk [vmem:[%s874_s18 + $0x18] sm:$0xff] %vm565_vm2, %v532_v46  ;;  %v527_v49 = vadd.f32 %v526_v48, %v382_v36 }
 0x1a3   : > { %v720_v50 = vpop.f32.mrf.mxu1 }
 0x1a4   : > { %568 = vst.msk [vmem:[%s874_s18 + $0x10] sm:$0xff] %vm565_vm2, %v527_v49  ;;  %v542_v51 = vadd.f32 %v720_v50, %v397_v44 }
 0x1a5   : > { %v536_v53 = vpop.f32.mrf.mxu1 }
 0x1a6   : > { %571 = vst.msk [vmem:[%s874_s18 + $0x28] sm:$0xff] %vm565_vm2, %v542_v51  ;;  %v537_v54 = vadd.f32 %v536_v53, %v392_v47 }
 0x1a7   : > { %v723_v56 = vpop.f32.mrf.mxu1 }
 0x1a8   : > { %570 = vst.msk [vmem:[%s874_s18 + $0x20] sm:$0xff] %vm565_vm2, %v537_v54  ;;  %v552_v57 = vadd.f32 %v723_v56, %v407_v52 }
 0x1a9   : > { %v546_v58 = vpop.f32.mrf.mxu1 }
 0x1aa   : > { %573 = vst.msk [vmem:[%s874_s18 + $0x38] sm:$0xff] %vm565_vm2, %v552_v57  ;;  %v547_v59 = vadd.f32 %v546_v58, %v402_v55 }
 0x1ab   : > { %v726_v61 = vpop.f32.mrf.mxu1 }
 0x1ac   : > { %572 = vst.msk [vmem:[%s874_s18 + $0x30] sm:$0xff] %vm565_vm2, %v547_v59  ;;  %v562_v62 = vadd.f32 %v726_v61, %v417_v60 }
 0x1ad   : > { %v556_v0 = vpop.f32.mrf.mxu1 }
 0x1ae   : > { %575 = vst.msk [vmem:[%s874_s18 + $0x48] sm:$0xff] %vm565_vm2, %v562_v62  ;;  %v557_v1 = vadd.f32 %v556_v0, %v412_v63 }
 0x1b0   : > { %574 = vst.msk [vmem:[%s874_s18 + $0x40] sm:$0xff] %vm565_vm2, %v557_v1 }
 0x1b1 PF: > { %s14_s15 = sadd.s32 1, %s745_s15  }
 0x1b2   : > { %p11_p4 = scmp.ge.s32.totalorder %s14_s15, 4  }
 0x1b4   :  { %13 = sbr.rel (!%p11_p4) target bundleno = 1 (0x1), region = 66 }

</bundles_post_ra>
